<compile_context>
chip_gen: v7x
topology: tpu7x:2x2x1
jax: 0.10.0
libtpu: 0.0.40
codegen_flags: <defaults>
</compile_context>

<pallas_src>
import functools
import math

import jax
import jax.numpy as jnp
from jax import lax
from jax.experimental import pallas as pl
from jax.experimental.pallas import tpu as pltpu


# -----------------------------------------------------------------------------
# Kernel 1: LoRA weight composition, both streams in one call.
#   W_flat[s] = (B_cat[s] @ A_cat[s]) * scaling,   s in {rgb, ir}
# -----------------------------------------------------------------------------
def _lora_weight_kernel(scaling, b_ref, a_ref, w_ref):
    w_ref[...] = (
        jnp.dot(b_ref[...], a_ref[...], preferred_element_type=jnp.float32)
        * scaling
    ).astype(w_ref.dtype)


def _build_lora_weights(lora_A, lora_B, lora_A_rgb, lora_B_rgb,
                        lora_A_ir, lora_B_ir, scaling, c1, c2, k, mxu_dtype):
    """Returns both effective conv weights in im2col order: (2, c2, k*k*c1)."""
    b_both = jnp.stack([jnp.concatenate([lora_B, lora_B_rgb], axis=1),
                        jnp.concatenate([lora_B, lora_B_ir], axis=1)])   # (2, k*c1, Rt)
    a_both = jnp.stack([jnp.concatenate([lora_A, lora_A_rgb], axis=0),
                        jnp.concatenate([lora_A, lora_A_ir], axis=0)])   # (2, Rt, c2*k)
    rt = b_both.shape[-1]

    w_flat = pl.pallas_call(
        functools.partial(_lora_weight_kernel, scaling),
        out_shape=jax.ShapeDtypeStruct((2, k * c1, c2 * k), jnp.float32),
        grid=(2,),
        in_specs=[pl.BlockSpec((None, k * c1, rt), lambda s: (s, 0, 0)),
                  pl.BlockSpec((None, rt, c2 * k), lambda s: (s, 0, 0))],
        out_specs=pl.BlockSpec((None, k * c1, c2 * k), lambda s: (s, 0, 0)),
        compiler_params=pltpu.CompilerParams(
            dimension_semantics=("parallel",)),
    )(b_both, a_both)

    # PyTorch: (B_cat @ A_cat).view(c2, c1, k, k) -> row-major OIHW.
    w_oihw = w_flat.reshape(2, c2, c1, k, k)
    # Rearrange to the (kh, kw, ci) contraction order used by the im2col kernel.
    # This touches a few KB only; fusing it into the conv kernel would need an
    # in-kernel 4-D reshape/transpose for negligible gain, so XLA does it.
    w_mat = jnp.transpose(w_oihw, (0, 1, 3, 4, 2)).reshape(2, c2, k * k * c1)
    return w_mat.astype(mxu_dtype)


# -----------------------------------------------------------------------------
# Kernel 2: dual-stream conv2d (stride=1, dilation=1, groups=1, zero padding).
#
# Input per stream is the zero-padded image flattened over (Hp, Wp) with a
# (k-1)-element zero tail: shape (n, c1, Hp*Wp + k - 1).
# For a stride-1 conv, tap (kh, kw) of the im2col matrix is the contiguous
# slice x_flat[:, kh*Wp + kw : kh*Wp + kw + h_out*Wp], so the column matrix is
# built with plain contiguous copies into a VMEM scratch and the whole conv is
# ONE MXU dot per stream:  (c2, k*k*c1) @ (k*k*c1, h_out*Wp)  -> lane-dense
# (c2, h_out*Wp) output written straight in NCHW order.
# -----------------------------------------------------------------------------
def _conv_kernel(k, c1, wp, x_rgb_ref, x_ir_ref, w_ref, b_ref,
                 o_rgb_ref, o_ir_ref, col_ref):
    l_out = o_rgb_ref.shape[-1]          # h_out * wp
    bias = b_ref[...]                    # (c2, 1), hoisted once

    def one_stream(x_ref, w2d, o_ref):
        # Static k*k copy loop: each iteration is a contiguous load+store with
        # no carried vreg state, so live ranges stay per-iteration.
        for kh in range(k):
            for kw in range(k):
                t = kh * k + kw
                off = kh * wp + kw
                col_ref[t * c1:(t + 1) * c1, :] = x_ref[:, off:off + l_out]
        col = col_ref[...].astype(w2d.dtype)           # bf16 MXU inputs
        acc = jnp.dot(w2d, col, preferred_element_type=jnp.float32)
        o_ref[...] = (acc + bias).astype(o_ref.dtype)  # lane-dense store

    one_stream(x_rgb_ref, w_ref[0], o_rgb_ref)
    one_stream(x_ir_ref, w_ref[1], o_ir_ref)


def _dual_stream_conv(x_rgb, x_ir, w_mat_both, bias, k, padding):
    """x_*: (n, c1, H, W) NCHW f32.  Returns (y_rgb, y_ir) NCHW f32."""
    n, c1, h, w = x_rgb.shape
    c2 = w_mat_both.shape[1]
    kkc = w_mat_both.shape[2]
    ph, pw = padding
    hp, wp = h + 2 * ph, w + 2 * pw
    h_out, w_out = hp - k + 1, wp - k + 1
    l_out = h_out * wp                    # "wide" output row-stride = Wp
    lin = hp * wp + (k - 1)               # flat padded length + zero tail

    # TODO(synk): at real image sizes, fold this zero-pad/flatten into the
    # kernel (halo via masked col writes) to drop one extra HBM pass, and tile
    # the grid over output rows / c_out with a (k-1)-row halo so double-buffered
    # blocks fit v7x's 64 MiB VMEM (set vmem_limit_bytes accordingly).
    def flatten_pad(x):
        xp = jnp.pad(x, ((0, 0), (0, 0), (ph, ph), (pw, pw)))
        xf = xp.reshape(n, c1, hp * wp)
        return jnp.pad(xf, ((0, 0), (0, 0), (0, k - 1)))

    xr = flatten_pad(x_rgb)
    xi = flatten_pad(x_ir)
    bias2d = bias.reshape(c2, 1).astype(jnp.float32)

    x_spec = pl.BlockSpec((None, c1, lin), lambda b: (b, 0, 0))
    o_spec = pl.BlockSpec((None, c2, l_out), lambda b: (b, 0, 0))

    y_rgb_wide, y_ir_wide = pl.pallas_call(
        functools.partial(_conv_kernel, k, c1, wp),
        out_shape=(jax.ShapeDtypeStruct((n, c2, l_out), jnp.float32),
                   jax.ShapeDtypeStruct((n, c2, l_out), jnp.float32)),
        grid=(n,),
        in_specs=[x_spec, x_spec,
                  pl.BlockSpec((2, c2, kkc), lambda b: (0, 0, 0)),
                  pl.BlockSpec((c2, 1), lambda b: (0, 0))],
        out_specs=(o_spec, o_spec),
        scratch_shapes=[pltpu.VMEM((k * k * c1, l_out), jnp.float32)],
        compiler_params=pltpu.CompilerParams(
            dimension_semantics=("parallel",)),
    )(xr, xi, w_mat_both, bias2d)

    # Strip the (wp - w_out) wrap columns per output row; result is NCHW already.
    def unwiden(y):
        return y.reshape(n, c2, h_out, wp)[..., :w_out]

    return unwiden(y_rgb_wide), unwiden(y_ir_wide)


# -----------------------------------------------------------------------------
# Full forward (jitted so the tiny XLA glue ops fuse around the Pallas calls).
# -----------------------------------------------------------------------------
@functools.partial(
    jax.jit,
    static_argnames=("c1", "c2", "k", "padding", "scaling", "mxu_dtype"))
def lora_dual_conv_forward(params, x_rgb, x_ir, *, c1, c2, k, padding,
                           scaling, mxu_dtype):
    (lora_A, lora_B, lora_A_rgb, lora_B_rgb, lora_A_ir, lora_B_ir, bias) = params
    w_mat_both = _build_lora_weights(
        lora_A, lora_B, lora_A_rgb, lora_B_rgb, lora_A_ir, lora_B_ir,
        scaling, c1, c2, k, mxu_dtype)
    return _dual_stream_conv(x_rgb, x_ir, w_mat_both, bias, k, padding)


# -----------------------------------------------------------------------------
# Module-equivalent wrapper
# -----------------------------------------------------------------------------
class Conv2dAllLoraM:
    """JAX/Pallas port of Conv2d_all_lora_m (padding_mode='zeros', groups=1)."""

    def __init__(self, key, c1, c2, k, r, lora_alpha, lora_dropout=0.0,
                 stride=1, padding=1, groups=1, dilation=1, bias=True,
                 mxu_dtype=jnp.bfloat16):
        assert groups == 1 and stride == 1 and dilation == 1, \
            "port supports groups=1, stride=1, dilation=1"
        assert not isinstance(padding, str), "string padding not supported"
        # TODO(synk): padding_mode != 'zeros' branch not implemented.
        self.c1, self.c2, self.k = c1, c2, k
        self.padding = (padding, padding) if isinstance(padding, int) \
            else tuple(padding)
        self.scaling = float(lora_alpha) / float(r)
        self.mxu_dtype = mxu_dtype
        # TODO(synk): lora_dropout is stored but unused — matches the reference
        # PyTorch forward, which never applies it.
        self.lora_dropout = lora_dropout

        inter = c1 * c2 * k * k / (c1 * k + c2 * k)
        self.inter_r = max(math.floor(inter * r), 1)
        self.inter_r_aux = max(math.floor(inter * (1 - r)), 1)

        keys = jax.random.split(key, 7)

        def kaiming_uniform(kk, shape):
            bound = 1.0 / math.sqrt(shape[1])     # kaiming_uniform(a=sqrt(5))
            return jax.random.uniform(kk, shape, jnp.float32, -bound, bound)

        self.lora_A = kaiming_uniform(keys[0], (self.inter_r, c2 * k))
        self.lora_B = kaiming_uniform(keys[1], (k * c1, self.inter_r))
        self.lora_A_rgb = kaiming_uniform(keys[2], (self.inter_r_aux, c2 * k))
        self.lora_B_rgb = kaiming_uniform(keys[3], (k * c1, self.inter_r_aux))
        self.lora_A_ir = kaiming_uniform(keys[4], (self.inter_r_aux, c2 * k))
        self.lora_B_ir = kaiming_uniform(keys[5], (k * c1, self.inter_r_aux))
        if bias:
            self.bias = jax.random.uniform(keys[6], (c2,), jnp.float32, -0.1, 0.1)
        else:
            self.bias = jnp.zeros((c2,), jnp.float32)

    def __call__(self, x):
        x_rgb, x_ir = x
        params = (self.lora_A, self.lora_B, self.lora_A_rgb, self.lora_B_rgb,
                  self.lora_A_ir, self.lora_B_ir, self.bias)
        return lora_dual_conv_forward(
            params, x_rgb, x_ir, c1=self.c1, c2=self.c2, k=self.k,
            padding=self.padding, scaling=self.scaling,
            mxu_dtype=self.mxu_dtype)


# -----------------------------------------------------------------------------
# Pure-JAX (full f32) reference for the sanity check.
# -----------------------------------------------------------------------------
def _reference_forward(mod, x_rgb, x_ir):
    def make_w(B_aux, A_aux):
        w = (jnp.concatenate([mod.lora_B, B_aux], axis=1)
             @ jnp.concatenate([mod.lora_A, A_aux], axis=0)) * mod.scaling
        return w.reshape(mod.c2, mod.c1, mod.k, mod.k)     # OIHW, like .view()

    def conv(x, w):
        y = lax.conv_general_dilated(
            x, w, window_strides=(1, 1),
            padding=[(mod.padding[0], mod.padding[0]),
                     (mod.padding[1], mod.padding[1])],
            dimension_numbers=("NCHW", "OIHW", "NCHW"),
            precision=lax.Precision.HIGHEST)
        return y + mod.bias[None, :, None, None]

    return (conv(x_rgb, make_w(mod.lora_B_rgb, mod.lora_A_rgb)),
            conv(x_ir, make_w(mod.lora_B_ir, mod.lora_A_ir)))


if __name__ == "__main__":
    key = jax.random.PRNGKey(0)
    k_params, k_rgb, k_ir = jax.random.split(key, 3)

    # module config: c1=4 -> c2=8, k=3, r=0.5, lora_alpha=1
    c1, c2, ksz = 4, 8, 3
    n, hw = 2, 16

    module = Conv2dAllLoraM(k_params, c1=c1, c2=c2, k=ksz, r=0.5,
                            lora_alpha=1.0, lora_dropout=0.0,
                            stride=1, padding=1, groups=1, dilation=1,
                            bias=True, mxu_dtype=jnp.bfloat16)

    # inputs: tuple (x_rgb, x_ir), NCHW
    x_rgb = jax.random.normal(k_rgb, (n, c1, hw, hw), jnp.float32)
    x_ir = jax.random.normal(k_ir, (n, c1, hw, hw), jnp.float32)

    y_rgb, y_ir = module((x_rgb, x_ir))
    jax.block_until_ready(y_rgb)
    jax.block_until_ready(y_ir)

    # sanity check against an independent full-f32 XLA reference
    # (tolerance sized for bf16 MXU inputs with f32 accumulation)
    ref_rgb, ref_ir = _reference_forward(module, x_rgb, x_ir)

    assert y_rgb.shape == (n, c2, hw, hw) and y_ir.shape == (n, c2, hw, hw)
    assert jnp.allclose(y_rgb, ref_rgb, rtol=2e-2, atol=2e-2)
    assert jnp.allclose(y_ir, ref_ir, rtol=2e-2, atol=2e-2)

    print("KERNEL_OK")
</pallas_src>

<mosaic_0001>
module attributes {stable_mosaic.version = 11 : i64} {
  func.func @_lora_weight_kernel(%arg0: i32, %arg1: memref<1x12x8xf32, #tpu.memory_space<vmem>>, %arg2: memref<1x8x24xf32, #tpu.memory_space<vmem>>, %arg3: memref<1x12x24xf32, #tpu.memory_space<vmem>>) attributes {dimension_semantics = [#tpu.dimension_semantics<parallel>], iteration_bounds = array<i64: 2>, scalar_prefetch = 0 : i64, scratch_operands = 0 : i64, tpu.core_type = #tpu.core_type<tc>, window_params = [{transform_indices = @transform_0, window_bounds = array<i64: 1, 12, 8>}, {transform_indices = @transform_1, window_bounds = array<i64: 1, 8, 24>}, {transform_indices = @transform_2, window_bounds = array<i64: 1, 12, 24>}]} {
    %c0 = arith.constant 0 : index
    %c0_0 = arith.constant 0 : index
    %c0_1 = arith.constant 0 : index
    %0 = vector.load %arg1[%c0, %c0_0, %c0_1] : memref<1x12x8xf32, #tpu.memory_space<vmem>>, vector<1x12x8xf32>
    %1 = vector.shape_cast %0 : vector<1x12x8xf32> to vector<12x8xf32>
    %c0_2 = arith.constant 0 : index
    %c0_3 = arith.constant 0 : index
    %c0_4 = arith.constant 0 : index
    %2 = vector.load %arg2[%c0_2, %c0_3, %c0_4] : memref<1x8x24xf32, #tpu.memory_space<vmem>>, vector<1x8x24xf32>
    %3 = vector.shape_cast %2 : vector<1x8x24xf32> to vector<8x24xf32>
    %cst = arith.constant dense<0.000000e+00> : vector<12x24xf32>
    %4 = tpu.matmul %1, %3, %cst {dimension_numbers = #tpu.dot_dimension_numbers<[1], [0], [0], [1], [0, 0, 1, 1], [], []>} : vector<12x8xf32>, vector<8x24xf32>, vector<12x24xf32> -> vector<12x24xf32>
    %cst_5 = arith.constant 2.000000e+00 : f32
    %5 = vector.broadcast %cst_5 : f32 to vector<12x24xf32>
    %6 = arith.mulf %4, %5 : vector<12x24xf32>
    %c0_6 = arith.constant 0 : index
    %c0_7 = arith.constant 0 : index
    %c0_8 = arith.constant 0 : index
    %7 = vector.load %arg3[%c0_6, %c0_7, %c0_8] : memref<1x12x24xf32, #tpu.memory_space<vmem>>, vector<1x12x24xf32>
    %8 = vector.shape_cast %7 : vector<1x12x24xf32> to vector<12x24xf32>
    %9 = vector.shape_cast %6 : vector<12x24xf32> to vector<1x12x24xf32>
    tpu.vector_store %arg3[%c0_6, %c0_7, %c0_8], %9 {strides = array<i32>} : memref<1x12x24xf32, #tpu.memory_space<vmem>>, vector<1x12x24xf32>,
    return
  }
  func.func @transform_0(%arg0: i32) -> (i32, i32, i32) {
    %c0_i32 = arith.constant 0 : i32
    %c0_i32_0 = arith.constant 0 : i32
    %c0_i32_1 = arith.constant 0 : i32
    return %arg0, %c0_i32, %c0_i32_0 : i32, i32, i32
  }
  func.func @transform_1(%arg0: i32) -> (i32, i32, i32) {
    %c0_i32 = arith.constant 0 : i32
    %c0_i32_0 = arith.constant 0 : i32
    %c0_i32_1 = arith.constant 0 : i32
    return %arg0, %c0_i32, %c0_i32_0 : i32, i32, i32
  }
  func.func @transform_2(%arg0: i32) -> (i32, i32, i32) {
    %c0_i32 = arith.constant 0 : i32
    %c0_i32_0 = arith.constant 0 : i32
    %c0_i32_1 = arith.constant 0 : i32
    return %arg0, %c0_i32, %c0_i32_0 : i32, i32, i32
  }
}

module attributes {stable_mosaic.version = 11 : i64} {
  func.func @_conv_kernel(%arg0: i32, %arg1: memref<1x4x326xf32, #tpu.memory_space<vmem>>, %arg2: memref<1x4x326xf32, #tpu.memory_space<vmem>>, %arg3: memref<2x8x36xbf16, #tpu.memory_space<vmem>>, %arg4: memref<8x1xf32, #tpu.memory_space<vmem>>, %arg5: memref<1x8x288xf32, #tpu.memory_space<vmem>>, %arg6: memref<1x8x288xf32, #tpu.memory_space<vmem>>, %arg7: memref<36x288xf32, #tpu.memory_space<vmem>>) attributes {dimension_semantics = [#tpu.dimension_semantics<parallel>], iteration_bounds = array<i64: 2>, scalar_prefetch = 0 : i64, scratch_operands = 1 : i64, tpu.core_type = #tpu.core_type<tc>, window_params = [{transform_indices = @transform_0, window_bounds = array<i64: 1, 4, 326>}, {transform_indices = @transform_1, window_bounds = array<i64: 1, 4, 326>}, {pipeline_mode = #tpu.pipeline_mode<synchronous>, transform_indices = @transform_2, window_bounds = array<i64: 2, 8, 36>}, {pipeline_mode = #tpu.pipeline_mode<synchronous>, transform_indices = @transform_3, window_bounds = array<i64: 8, 1>}, {transform_indices = @transform_4, window_bounds = array<i64: 1, 8, 288>}, {transform_indices = @transform_5, window_bounds = array<i64: 1, 8, 288>}]} {
    %c0 = arith.constant 0 : index
    %c0_0 = arith.constant 0 : index
    %0 = vector.load %arg4[%c0, %c0_0] : memref<8x1xf32, #tpu.memory_space<vmem>>, vector<8x1xf32>
    %c0_1 = arith.constant 0 : index
    %c0_2 = arith.constant 0 : index
    %c0_3 = arith.constant 0 : index
    %1 = vector.load %arg3[%c0_1, %c0_2, %c0_3] : memref<2x8x36xbf16, #tpu.memory_space<vmem>>, vector<1x8x36xbf16>
    %2 = vector.shape_cast %1 : vector<1x8x36xbf16> to vector<8x36xbf16>
    %c0_4 = arith.constant 0 : index
    %c0_5 = arith.constant 0 : index
    %c0_6 = arith.constant 0 : index
    %3 = vector.load %arg1[%c0_4, %c0_5, %c0_6] : memref<1x4x326xf32, #tpu.memory_space<vmem>>, vector<1x4x288xf32>
    %4 = vector.shape_cast %3 : vector<1x4x288xf32> to vector<4x288xf32>
    %c0_7 = arith.constant 0 : index
    %c0_8 = arith.constant 0 : index
    %5 = vector.load %arg7[%c0_7, %c0_8] : memref<36x288xf32, #tpu.memory_space<vmem>>, vector<4x288xf32>
    tpu.vector_store %arg7[%c0_7, %c0_8], %4 {strides = array<i32>} : memref<36x288xf32, #tpu.memory_space<vmem>>, vector<4x288xf32>,
    %c0_9 = arith.constant 0 : index
    %c0_10 = arith.constant 0 : index
    %c1 = arith.constant 1 : index
    %6 = vector.load %arg1[%c0_9, %c0_10, %c1] : memref<1x4x326xf32, #tpu.memory_space<vmem>>, vector<1x4x288xf32>
    %7 = vector.shape_cast %6 : vector<1x4x288xf32> to vector<4x288xf32>
    %c4 = arith.constant 4 : index
    %c0_11 = arith.constant 0 : index
    %8 = vector.load %arg7[%c4, %c0_11] : memref<36x288xf32, #tpu.memory_space<vmem>>, vector<4x288xf32>
    tpu.vector_store %arg7[%c4, %c0_11], %7 {strides = array<i32>} : memref<36x288xf32, #tpu.memory_space<vmem>>, vector<4x288xf32>,
    %c0_12 = arith.constant 0 : index
    %c0_13 = arith.constant 0 : index
    %c2 = arith.constant 2 : index
    %9 = vector.load %arg1[%c0_12, %c0_13, %c2] : memref<1x4x326xf32, #tpu.memory_space<vmem>>, vector<1x4x288xf32>
    %10 = vector.shape_cast %9 : vector<1x4x288xf32> to vector<4x288xf32>
    %c8 = arith.constant 8 : index
    %c0_14 = arith.constant 0 : index
    %11 = vector.load %arg7[%c8, %c0_14] : memref<36x288xf32, #tpu.memory_space<vmem>>, vector<4x288xf32>
    tpu.vector_store %arg7[%c8, %c0_14], %10 {strides = array<i32>} : memref<36x288xf32, #tpu.memory_space<vmem>>, vector<4x288xf32>,
    %c0_15 = arith.constant 0 : index
    %c0_16 = arith.constant 0 : index
    %c18 = arith.constant 18 : index
    %12 = vector.load %arg1[%c0_15, %c0_16, %c18] : memref<1x4x326xf32, #tpu.memory_space<vmem>>, vector<1x4x288xf32>
    %13 = vector.shape_cast %12 : vector<1x4x288xf32> to vector<4x288xf32>
    %c12 = arith.constant 12 : index
    %c0_17 = arith.constant 0 : index
    %14 = vector.load %arg7[%c12, %c0_17] : memref<36x288xf32, #tpu.memory_space<vmem>>, vector<4x288xf32>
    tpu.vector_store %arg7[%c12, %c0_17], %13 {strides = array<i32>} : memref<36x288xf32, #tpu.memory_space<vmem>>, vector<4x288xf32>,
    %c0_18 = arith.constant 0 : index
    %c0_19 = arith.constant 0 : index
    %c19 = arith.constant 19 : index
    %15 = vector.load %arg1[%c0_18, %c0_19, %c19] : memref<1x4x326xf32, #tpu.memory_space<vmem>>, vector<1x4x288xf32>
    %16 = vector.shape_cast %15 : vector<1x4x288xf32> to vector<4x288xf32>
    %c16 = arith.constant 16 : index
    %c0_20 = arith.constant 0 : index
    %17 = vector.load %arg7[%c16, %c0_20] : memref<36x288xf32, #tpu.memory_space<vmem>>, vector<4x288xf32>
    tpu.vector_store %arg7[%c16, %c0_20], %16 {strides = array<i32>} : memref<36x288xf32, #tpu.memory_space<vmem>>, vector<4x288xf32>,
    %c0_21 = arith.constant 0 : index
    %c0_22 = arith.constant 0 : index
    %c20 = arith.constant 20 : index
    %18 = vector.load %arg1[%c0_21, %c0_22, %c20] : memref<1x4x326xf32, #tpu.memory_space<vmem>>, vector<1x4x288xf32>
    %19 = vector.shape_cast %18 : vector<1x4x288xf32> to vector<4x288xf32>
    %c20_23 = arith.constant 20 : index
    %c0_24 = arith.constant 0 : index
    %20 = vector.load %arg7[%c20_23, %c0_24] : memref<36x288xf32, #tpu.memory_space<vmem>>, vector<4x288xf32>
    tpu.vector_store %arg7[%c20_23, %c0_24], %19 {strides = array<i32>} : memref<36x288xf32, #tpu.memory_space<vmem>>, vector<4x288xf32>,
    %c0_25 = arith.constant 0 : index
    %c0_26 = arith.constant 0 : index
    %c36 = arith.constant 36 : index
    %21 = vector.load %arg1[%c0_25, %c0_26, %c36] : memref<1x4x326xf32, #tpu.memory_space<vmem>>, vector<1x4x288xf32>
    %22 = vector.shape_cast %21 : vector<1x4x288xf32> to vector<4x288xf32>
    %c24 = arith.constant 24 : index
    %c0_27 = arith.constant 0 : index
    %23 = vector.load %arg7[%c24, %c0_27] : memref<36x288xf32, #tpu.memory_space<vmem>>, vector<4x288xf32>
    tpu.vector_store %arg7[%c24, %c0_27], %22 {strides = array<i32>} : memref<36x288xf32, #tpu.memory_space<vmem>>, vector<4x288xf32>,
    %c0_28 = arith.constant 0 : index
    %c0_29 = arith.constant 0 : index
    %c37 = arith.constant 37 : index
    %24 = vector.load %arg1[%c0_28, %c0_29, %c37] : memref<1x4x326xf32, #tpu.memory_space<vmem>>, vector<1x4x288xf32>
    %25 = vector.shape_cast %24 : vector<1x4x288xf32> to vector<4x288xf32>
    %c28 = arith.constant 28 : index
    %c0_30 = arith.constant 0 : index
    %26 = vector.load %arg7[%c28, %c0_30] : memref<36x288xf32, #tpu.memory_space<vmem>>, vector<4x288xf32>
    tpu.vector_store %arg7[%c28, %c0_30], %25 {strides = array<i32>} : memref<36x288xf32, #tpu.memory_space<vmem>>, vector<4x288xf32>,
    %c0_31 = arith.constant 0 : index
    %c0_32 = arith.constant 0 : index
    %c38 = arith.constant 38 : index
    %27 = vector.load %arg1[%c0_31, %c0_32, %c38] : memref<1x4x326xf32, #tpu.memory_space<vmem>>, vector<1x4x288xf32>
    %28 = vector.shape_cast %27 : vector<1x4x288xf32> to vector<4x288xf32>
    %c32 = arith.constant 32 : index
    %c0_33 = arith.constant 0 : index
    %29 = vector.load %arg7[%c32, %c0_33] : memref<36x288xf32, #tpu.memory_space<vmem>>, vector<4x288xf32>
    tpu.vector_store %arg7[%c32, %c0_33], %28 {strides = array<i32>} : memref<36x288xf32, #tpu.memory_space<vmem>>, vector<4x288xf32>,
    %c0_34 = arith.constant 0 : index
    %c0_35 = arith.constant 0 : index
    %30 = vector.load %arg7[%c0_34, %c0_35] : memref<36x288xf32, #tpu.memory_space<vmem>>, vector<36x288xf32>
    %31 = arith.truncf %30 : vector<36x288xf32> to vector<36x288xbf16>
    %cst = arith.constant dense<0.000000e+00> : vector<8x288xf32>
    %32 = tpu.matmul %2, %31, %cst {dimension_numbers = #tpu.dot_dimension_numbers<[1], [0], [0], [1], [0, 0, 1, 1], [], []>} : vector<8x36xbf16>, vector<36x288xbf16>, vector<8x288xf32> -> vector<8x288xf32>
    %33 = vector.broadcast %0 : vector<8x1xf32> to vector<8x288xf32>
    %34 = arith.addf %32, %33 : vector<8x288xf32>
    %c0_36 = arith.constant 0 : index
    %c0_37 = arith.constant 0 : index
    %c0_38 = arith.constant 0 : index
    %35 = vector.load %arg5[%c0_36, %c0_37, %c0_38] : memref<1x8x288xf32, #tpu.memory_space<vmem>>, vector<1x8x288xf32>
    %36 = vector.shape_cast %35 : vector<1x8x288xf32> to vector<8x288xf32>
    %37 = vector.shape_cast %34 : vector<8x288xf32> to vector<1x8x288xf32>
    tpu.vector_store %arg5[%c0_36, %c0_37, %c0_38], %37 {strides = array<i32>} : memref<1x8x288xf32, #tpu.memory_space<vmem>>, vector<1x8x288xf32>,
    %c1_39 = arith.constant 1 : index
    %c0_40 = arith.constant 0 : index
    %c0_41 = arith.constant 0 : index
    %38 = vector.load %arg3[%c1_39, %c0_40, %c0_41] : memref<2x8x36xbf16, #tpu.memory_space<vmem>>, vector<1x8x36xbf16>
    %39 = vector.shape_cast %38 : vector<1x8x36xbf16> to vector<8x36xbf16>
    %c0_42 = arith.constant 0 : index
    %c0_43 = arith.constant 0 : index
    %c0_44 = arith.constant 0 : index
    %40 = vector.load %arg2[%c0_42, %c0_43, %c0_44] : memref<1x4x326xf32, #tpu.memory_space<vmem>>, vector<1x4x288xf32>
    %41 = vector.shape_cast %40 : vector<1x4x288xf32> to vector<4x288xf32>
    %c0_45 = arith.constant 0 : index
    %c0_46 = arith.constant 0 : index
    %42 = vector.load %arg7[%c0_45, %c0_46] : memref<36x288xf32, #tpu.memory_space<vmem>>, vector<4x288xf32>
    tpu.vector_store %arg7[%c0_45, %c0_46], %41 {strides = array<i32>} : memref<36x288xf32, #tpu.memory_space<vmem>>, vector<4x288xf32>,
    %c0_47 = arith.constant 0 : index
    %c0_48 = arith.constant 0 : index
    %c1_49 = arith.constant 1 : index
    %43 = vector.load %arg2[%c0_47, %c0_48, %c1_49] : memref<1x4x326xf32, #tpu.memory_space<vmem>>, vector<1x4x288xf32>
    %44 = vector.shape_cast %43 : vector<1x4x288xf32> to vector<4x288xf32>
    %c4_50 = arith.constant 4 : index
    %c0_51 = arith.constant 0 : index
    %45 = vector.load %arg7[%c4_50, %c0_51] : memref<36x288xf32, #tpu.memory_space<vmem>>, vector<4x288xf32>
    tpu.vector_store %arg7[%c4_50, %c0_51], %44 {strides = array<i32>} : memref<36x288xf32, #tpu.memory_space<vmem>>, vector<4x288xf32>,
    %c0_52 = arith.constant 0 : index
    %c0_53 = arith.constant 0 : index
    %c2_54 = arith.constant 2 : index
    %46 = vector.load %arg2[%c0_52, %c0_53, %c2_54] : memref<1x4x326xf32, #tpu.memory_space<vmem>>, vector<1x4x288xf32>
    %47 = vector.shape_cast %46 : vector<1x4x288xf32> to vector<4x288xf32>
    %c8_55 = arith.constant 8 : index
    %c0_56 = arith.constant 0 : index
    %48 = vector.load %arg7[%c8_55, %c0_56] : memref<36x288xf32, #tpu.memory_space<vmem>>, vector<4x288xf32>
    tpu.vector_store %arg7[%c8_55, %c0_56], %47 {strides = array<i32>} : memref<36x288xf32, #tpu.memory_space<vmem>>, vector<4x288xf32>,
    %c0_57 = arith.constant 0 : index
    %c0_58 = arith.constant 0 : index
    %c18_59 = arith.constant 18 : index
    %49 = vector.load %arg2[%c0_57, %c0_58, %c18_59] : memref<1x4x326xf32, #tpu.memory_space<vmem>>, vector<1x4x288xf32>
    %50 = vector.shape_cast %49 : vector<1x4x288xf32> to vector<4x288xf32>
    %c12_60 = arith.constant 12 : index
    %c0_61 = arith.constant 0 : index
    %51 = vector.load %arg7[%c12_60, %c0_61] : memref<36x288xf32, #tpu.memory_space<vmem>>, vector<4x288xf32>
    tpu.vector_store %arg7[%c12_60, %c0_61], %50 {strides = array<i32>} : memref<36x288xf32, #tpu.memory_space<vmem>>, vector<4x288xf32>,
    %c0_62 = arith.constant 0 : index
    %c0_63 = arith.constant 0 : index
    %c19_64 = arith.constant 19 : index
    %52 = vector.load %arg2[%c0_62, %c0_63, %c19_64] : memref<1x4x326xf32, #tpu.memory_space<vmem>>, vector<1x4x288xf32>
    %53 = vector.shape_cast %52 : vector<1x4x288xf32> to vector<4x288xf32>
    %c16_65 = arith.constant 16 : index
    %c0_66 = arith.constant 0 : index
    %54 = vector.load %arg7[%c16_65, %c0_66] : memref<36x288xf32, #tpu.memory_space<vmem>>, vector<4x288xf32>
    tpu.vector_store %arg7[%c16_65, %c0_66], %53 {strides = array<i32>} : memref<36x288xf32, #tpu.memory_space<vmem>>, vector<4x288xf32>,
    %c0_67 = arith.constant 0 : index
    %c0_68 = arith.constant 0 : index
    %c20_69 = arith.constant 20 : index
    %55 = vector.load %arg2[%c0_67, %c0_68, %c20_69] : memref<1x4x326xf32, #tpu.memory_space<vmem>>, vector<1x4x288xf32>
    %56 = vector.shape_cast %55 : vector<1x4x288xf32> to vector<4x288xf32>
    %c20_70 = arith.constant 20 : index
    %c0_71 = arith.constant 0 : index
    %57 = vector.load %arg7[%c20_70, %c0_71] : memref<36x288xf32, #tpu.memory_space<vmem>>, vector<4x288xf32>
    tpu.vector_store %arg7[%c20_70, %c0_71], %56 {strides = array<i32>} : memref<36x288xf32, #tpu.memory_space<vmem>>, vector<4x288xf32>,
    %c0_72 = arith.constant 0 : index
    %c0_73 = arith.constant 0 : index
    %c36_74 = arith.constant 36 : index
    %58 = vector.load %arg2[%c0_72, %c0_73, %c36_74] : memref<1x4x326xf32, #tpu.memory_space<vmem>>, vector<1x4x288xf32>
    %59 = vector.shape_cast %58 : vector<1x4x288xf32> to vector<4x288xf32>
    %c24_75 = arith.constant 24 : index
    %c0_76 = arith.constant 0 : index
    %60 = vector.load %arg7[%c24_75, %c0_76] : memref<36x288xf32, #tpu.memory_space<vmem>>, vector<4x288xf32>
    tpu.vector_store %arg7[%c24_75, %c0_76], %59 {strides = array<i32>} : memref<36x288xf32, #tpu.memory_space<vmem>>, vector<4x288xf32>,
    %c0_77 = arith.constant 0 : index
    %c0_78 = arith.constant 0 : index
    %c37_79 = arith.constant 37 : index
    %61 = vector.load %arg2[%c0_77, %c0_78, %c37_79] : memref<1x4x326xf32, #tpu.memory_space<vmem>>, vector<1x4x288xf32>
    %62 = vector.shape_cast %61 : vector<1x4x288xf32> to vector<4x288xf32>
    %c28_80 = arith.constant 28 : index
    %c0_81 = arith.constant 0 : index
    %63 = vector.load %arg7[%c28_80, %c0_81] : memref<36x288xf32, #tpu.memory_space<vmem>>, vector<4x288xf32>
    tpu.vector_store %arg7[%c28_80, %c0_81], %62 {strides = array<i32>} : memref<36x288xf32, #tpu.memory_space<vmem>>, vector<4x288xf32>,
    %c0_82 = arith.constant 0 : index
    %c0_83 = arith.constant 0 : index
    %c38_84 = arith.constant 38 : index
    %64 = vector.load %arg2[%c0_82, %c0_83, %c38_84] : memref<1x4x326xf32, #tpu.memory_space<vmem>>, vector<1x4x288xf32>
    %65 = vector.shape_cast %64 : vector<1x4x288xf32> to vector<4x288xf32>
    %c32_85 = arith.constant 32 : index
    %c0_86 = arith.constant 0 : index
    %66 = vector.load %arg7[%c32_85, %c0_86] : memref<36x288xf32, #tpu.memory_space<vmem>>, vector<4x288xf32>
    tpu.vector_store %arg7[%c32_85, %c0_86], %65 {strides = array<i32>} : memref<36x288xf32, #tpu.memory_space<vmem>>, vector<4x288xf32>,
    %c0_87 = arith.constant 0 : index
    %c0_88 = arith.constant 0 : index
    %67 = vector.load %arg7[%c0_87, %c0_88] : memref<36x288xf32, #tpu.memory_space<vmem>>, vector<36x288xf32>
    %68 = arith.truncf %67 : vector<36x288xf32> to vector<36x288xbf16>
    %cst_89 = arith.constant dense<0.000000e+00> : vector<8x288xf32>
    %69 = tpu.matmul %39, %68, %cst_89 {dimension_numbers = #tpu.dot_dimension_numbers<[1], [0], [0], [1], [0, 0, 1, 1], [], []>} : vector<8x36xbf16>, vector<36x288xbf16>, vector<8x288xf32> -> vector<8x288xf32>
    %70 = vector.broadcast %0 : vector<8x1xf32> to vector<8x288xf32>
    %71 = arith.addf %69, %70 : vector<8x288xf32>
    %c0_90 = arith.constant 0 : index
    %c0_91 = arith.constant 0 : index
    %c0_92 = arith.constant 0 : index
    %72 = vector.load %arg6[%c0_90, %c0_91, %c0_92] : memref<1x8x288xf32, #tpu.memory_space<vmem>>, vector<1x8x288xf32>
    %73 = vector.shape_cast %72 : vector<1x8x288xf32> to vector<8x288xf32>
    %74 = vector.shape_cast %71 : vector<8x288xf32> to vector<1x8x288xf32>
    tpu.vector_store %arg6[%c0_90, %c0_91, %c0_92], %74 {strides = array<i32>} : memref<1x8x288xf32, #tpu.memory_space<vmem>>, vector<1x8x288xf32>,
    return
  }
  func.func @transform_0(%arg0: i32) -> (i32, i32, i32) {
    %c0_i32 = arith.constant 0 : i32
    %c0_i32_0 = arith.constant 0 : i32
    %c0_i32_1 = arith.constant 0 : i32
    return %arg0, %c0_i32, %c0_i32_0 : i32, i32, i32
  }
  func.func @transform_1(%arg0: i32) -> (i32, i32, i32) {
    %c0_i32 = arith.constant 0 : i32
    %c0_i32_0 = arith.constant 0 : i32
    %c0_i32_1 = arith.constant 0 : i32
    return %arg0, %c0_i32, %c0_i32_0 : i32, i32, i32
  }
  func.func @transform_2(%arg0: i32) -> (i32, i32, i32) {
    %c0_i32 = arith.constant 0 : i32
    %c0_i32_0 = arith.constant 0 : i32
    %c0_i32_1 = arith.constant 0 : i32
    %c0_i32_2 = arith.constant 0 : i32
    return %c0_i32, %c0_i32_0, %c0_i32_1 : i32, i32, i32
  }
  func.func @transform_3(%arg0: i32) -> (i32, i32) {
    %c0_i32 = arith.constant 0 : i32
    %c0_i32_0 = arith.constant 0 : i32
    %c0_i32_1 = arith.constant 0 : i32
    return %c0_i32, %c0_i32_0 : i32, i32
  }
  func.func @transform_4(%arg0: i32) -> (i32, i32, i32) {
    %c0_i32 = arith.constant 0 : i32
    %c0_i32_0 = arith.constant 0 : i32
    %c0_i32_1 = arith.constant 0 : i32
    return %arg0, %c0_i32, %c0_i32_0 : i32, i32, i32
  }
  func.func @transform_5(%arg0: i32) -> (i32, i32, i32) {
    %c0_i32 = arith.constant 0 : i32
    %c0_i32_0 = arith.constant 0 : i32
    %c0_i32_1 = arith.constant 0 : i32
    return %arg0, %c0_i32, %c0_i32_0 : i32, i32, i32
  }
}

</mosaic_0001>

<bundles_post_ra>
// kernel: lora_dual_conv_forward.2
= control target key start
LH: loop header
LB: loop body
LE: loop exit
PB: predicated region body
PF: predicated region fallthrough
CT: control target
= control target key end

     0   :  { %s374_s9 = smov 0   ;;  %s394_s0 = inlined_call_operand.vmem [shape: f32[2,12,8], index: 0, kind: input, shape index: {}]   ;;  %s395_s1 = inlined_call_operand.vmem [shape: f32[2,8,24], index: 1, kind: input, shape index: {}]   ;;  %s396_s2 = inlined_call_operand.vmem [shape: f32[2,12,24], index: 2, kind: output, shape index: {}]  }
   0x1 LB: > { %s319_s10 = sadd.s32 4294967295, %s357_s9   ;;  %p323_p0 = scmp.ge.s32.totalorder %s357_s9, 1  ;;  %s357_s9 = sphi %s374_s9, %s12_s9  }
   0x2   : > { %p121_p1 = scmp.lt.s32.totalorder %s357_s9, 3 }
   0x4   : > { %p122_p2 = pnand %p323_p0, %p121_p1 }
   0x5   : > { %p147_p3 = scmp.lt.s32.totalorder (!%p122_p2), %s319_s10, 1  ;;  %vm164_vm0 = vcmask (!%p122_p2), 64512   ;;  %vm250_vm1 = vcmask (!%p122_p2), 191488   ;;  %vm248_vm2 = vcmask (!%p122_p2), 195584  }
   0x6   : > { %125 = sbr.rel (%p122_p2) target bundleno = 235 (0xeb), region = 28 }
   0xd   : > { %s398_s10 = smov (!%p147_p3, %s319_s10), 1 }
   0xe   : > { %s326_s11 = sshll.u32 %s398_s10, 3  ;;  %s333_s12 = sshll.u32 %s398_s10, 4 }
   0xf   : > { %s155_s15 = scalar_lea.vmem %s395_s1, %s326_s11  ;;  %s151_s18 = scalar_lea.vmem %s394_s0, %s333_s12 }
  0x10   : > { %v163_v0 = vld [vmem:[%s155_s15] sm:$0xff]  ;;  %v162_v2 = vld [vmem:[%s151_s18 + $0x8] sm:$0xf]  ;;  %s160_s21 = scalar_lea.vmem %s396_s2, %s333_s12 }
  0x11   : > { %v161_v1 = vld [vmem:[%s151_s18] sm:$0xff]  ;;  %338 = vmatprep.subr.mxu0 %v163_v0 }
  0x12   : > { %340 = vmatprep.mubr.msk.f32.mxu0 %vm164_vm0, %v161_v1  ;;  %339 = vmatpush3.msra.mxu0 %v163_v0 }
  0x13   : > { %341 = vmatmul.mubr.msk.f32.vlgmr.msra.gmra.mrb[0].mxu0 %vm164_vm0, %v162_v2 }
  0xe6   : > { %v342_v3 = vpop.f32.mrb[0].mxu0 }
  0xe7   : > { %v247_v4 = vmul.f32 2.0, %v342_v3  ;;  %v237_v5 = vpop.f32.mrb[1].mxu0 }
  0xe8   : > { %v246_v6 = vmul.f32 2.0, %v237_v5 }
  0xe9   : > { %251 = vst.msk [vmem:[%s160_s21 + $0x8] sm:$0xf] %vm250_vm1, %v247_v4 }
  0xea   : > { %249 = vst.msk [vmem:[%s160_s21] sm:$0xff] %vm248_vm2, %v246_v6 }
  0xeb PF: > { %s12_s9 = sadd.s32 1, %s357_s9  }
  0xec   : > { %p9_p4 = scmp.ge.s32.totalorder %s12_s9, 4  }
  0xee   :  { %11 = sbr.rel (!%p9_p4) target bundleno = 1 (0x1), region = 61 }

// kernel: lora_dual_conv_forward.3
= control target key start
LH: loop header
LB: loop body
LE: loop exit
PB: predicated region body
PF: predicated region fallthrough
CT: control target
= control target key end

     0   :  { %s1078_s18 = smov 0   ;;  %s1283_s0 = inlined_call_operand.vmem [shape: f32[2,4,326], index: 0, kind: input, shape index: {}]   ;;  %s1284_s1 = inlined_call_operand.vmem [shape: f32[2,4,326], index: 1, kind: input, shape index: {}]   ;;  %s1285_s2 = inlined_call_operand.vmem [shape: bf16[2,8,36], index: 2, kind: input, shape index: {}]   ;;  %s1286_s3 = inlined_call_operand.vmem [shape: f32[8,1], index: 3, kind: input, shape index: {}]   ;;  %s1287_s4 = inlined_call_operand.vmem [shape: f32[2,8,288], index: 4, kind: output, shape index: {0}]   ;;  %s1288_s5 = inlined_call_operand.vmem [shape: f32[2,8,288], index: 5, kind: output, shape index: {1}]  }
   0x1 LB: > { %s949_s19 = sadd.s32 4294967295, %s1035_s18   ;;  %p953_p0 = scmp.ge.s32.totalorder %s1035_s18, 1  ;;  %s1035_s18 = sphi %s1078_s18, %s16_s18  }
   0x2   : > { %p200_p1 = scmp.lt.s32.totalorder %s1035_s18, 3 }
   0x4   : > { %p201_p2 = pnand %p953_p0, %p200_p1 }
   0x5   : > { %p238_p3 = scmp.lt.s32.totalorder (!%p201_p2), %s949_s19, 1  ;;  %s1037_s24 = smov (!%p201_p2), 126   ;;  %v1040_v5 = vmov (!%p201_p2), 0.0   ;;  %vm268_vm0 = vcmask (!%p201_p2), 257024   ;;  %vm1046_vm1 = vmmov (!%p201_p2), 0   ;;  %v1047_v19 = vmov (!%p201_p2), 0  }
   0x6   : > { %204 = sbr.rel (%p201_p2) target bundleno = 456 (0x1c8), region = 36  ;;  %s1038_s25 = smov (!%p201_p2), 127   ;;  %975 = vmatprep.subr.bf16.mxu1 (!%p201_p2), %v1040_v5  ;;  %981 = vmatprep.mubr.msk.bf16.mxu1 (!%p201_p2), %vm1046_vm1, %v1040_v5  ;;  %v259_v25 = vld [vmem:[%s1286_s3] sm:$0xff] (!%p201_p2)  ;;  %vm303_vm2 = vcmask (!%p201_p2), 1031168   ;;  %vm290_vm3 = vcmask (!%p201_p2), 261124   ;;  %vm324_vm4 = vcmask (!%p201_p2), 900096  }
   0x7   : > { %s1039_s29 = smov (!%p201_p2), 110   ;;  %s1041_s30 = smov (!%p201_p2), 109   ;;  %510 = vmatprep.mubr.bf16.mxu0 (!%p201_p2), %v1047_v19  ;;  %1016 = vset.pattern.permute.xlu0 (!%p201_p2), %v1047_v19  ;;  %vm282_vm5 = vcmask (!%p201_p2), 1039360   ;;  %vm344_vm6 = vcmask (!%p201_p2), 891904   ;;  %vm365_vm7 = vcmask (!%p201_p2), 883712   ;;  %vm385_vm8 = vcmask (!%p201_p2), 752640  }
   0x8   : > { %s1042_s6 = smov (!%p201_p2), 108   ;;  %s1043_s7 = smov (!%p201_p2), 92   ;;  %vm406_vm9 = vcmask (!%p201_p2), 744448   ;;  %vm426_vm10 = vcmask (!%p201_p2), 736256   ;;  %vm468_vm11 = vcmask (!%p201_p2), 1041408   ;;  %vm464_vm12 = vcmask (!%p201_p2), 293888  }
   0x9   : > { %s1044_s8 = smov (!%p201_p2), 91   ;;  %s1045_s9 = smov (!%p201_p2), 90   ;;  %vm561_vm13 = vcmask (!%p201_p2), 261120  }
   0xd   : > { %s1290_s19 = smov (!%p238_p3, %s949_s19), 1 }
   0xe   : > { %s995_s20 = smul.u32 12, %s1290_s19 }
   0xf   : > { %s996_s16 = smul.u32 24, %s1290_s19 }
  0x10   : > { %s1092_s23 = scalar_lea.vmem %s1283_s0, %s995_s20  ;;  %s1101_s28 = scalar_lea.vmem %s1284_s1, %s995_s20 }
  0x11   : > { %v293_v0 = vld [vmem:[%s1092_s23 + $0x8] sm:$0xf]  ;;  %v270_v1 = vld [vmem:[%s1092_s23] sm:$0xff]  ;;  %s252_s21 = scalar_lea.vmem %s1287_s4, %s996_s16 }
  0x12   : > { %301 = vrot.lane.b32.xlu1 %v293_v0, %s1037_s24  ;;  %278 = vrot.lane.b32.xlu0 %v270_v1, %s1038_s25  ;;  %v296_v2 = vcombine.high %v270_v1, %v270_v1  ;;  %266 = vst [vmem:[#allocation2] sm:$0xf] %v270_v1  ;;  %v1019_v3 = vld [vmem:[%s1092_s23 + $0x8] ss:$0 sps:$4 sm:$0xff]   ;;  %v274_v6 = vcombine.low %v270_v1, %v270_v1  ;;  %v1137_v14 = vld [vmem:[%s1101_s28] sm:$0xff] }
  0x13   : > { %v1020_v4 = vld [vmem:[%s1092_s23 + $0x8] ss:$0 sps:$4 sm:$0xff]   ;;  %v1144_v15 = vcombine.high %v1137_v14, %v1137_v14  ;;  %v577_v18 = vcombine.low %v1137_v14, %v1137_v14 }
  0x14   : > { %267 = vst [vmem:[#allocation2 + $0x8] sm:$0xf] %v296_v2  ;;  %v262_v7 = vld [vmem:[%s1092_s23 + $0x8] sm:$0xf] }
  0x15   : > { %269 = vst.msk [vmem:[#allocation2 + $0x10] sm:$0xf] %vm268_vm0, %v262_v7  ;;  %v334_v8 = vld [vmem:[%s1092_s23 + $0x8] sm:$0xf] }
  0x16   : > { %299 = vrot.lane.b32.xlu1 %v296_v2, %s1037_s24  ;;  %320 = vrot.lane.b32.xlu0 %v270_v1, %s1039_s29  ;;  %v1021_v9 = vld [vmem:[%s1092_s23 + $0x8] ss:$0 sps:$4 sm:$0xff]  }
  0x17   : > { %v375_v10 = vld [vmem:[%s1092_s23 + $0x8] sm:$0xf] }
  0x18   : > { %v1022_v11 = vld [vmem:[%s1092_s23 + $0x8] ss:$0 sps:$4 sm:$0xff]  }
  0x19   : > { %v416_v12 = vld [vmem:[%s1092_s23 + $0x8] sm:$0xf]  ;;  %s257_s23 = scalar_lea.vmem %s1288_s5, %s996_s16 }
  0x1a   : > { %322 = vrot.lane.b32.xlu1 %v1019_v3, %s1039_s29  ;;  %280 = vrot.lane.b32.xlu0 %v1020_v4, %s1038_s25  ;;  %v1023_v13 = vld [vmem:[%s1101_s28 + $0x8] ss:$0 sps:$4 sm:$0xff]  }
  0x1b   : > { %v594_v16 = vld [vmem:[%s1101_s28 + $0x8] sm:$0xf] }
  0x1c   : > { %v1026_v17 = vld [vmem:[%s1101_s28 + $0x8] ss:$0 sps:$4 sm:$0xff]  }
  0x1d   : > { %v633_v20 = vld [vmem:[%s1101_s28 + $0x8] sm:$0xf] }
  0x1e   : > { %297 = vrot.lane.b32.xlu1 %v270_v1, %s1037_s24  ;;  %276 = vrot.lane.b32.xlu0 %v274_v6, %s1038_s25  ;;  %v1027_v21 = vld [vmem:[%s1101_s28 + $0x8] ss:$0 sps:$4 sm:$0xff]  }
  0x1f   : > { %v672_v22 = vld [vmem:[%s1101_s28 + $0x8] sm:$0xf] }
  0x20   : > { %v1028_v23 = vld [vmem:[%s1101_s28 + $0x8] ss:$0 sps:$4 sm:$0xff]  }
  0x21   : > { %v711_v24 = vld [vmem:[%s1101_s28 + $0x8] sm:$0xf] }
  0x22   : > { %340 = vrot.lane.b32.xlu1 %v296_v2, %s1041_s30  ;;  %318 = vrot.lane.b32.xlu0 %v274_v6, %s1039_s29  ;;  %v566_v39 = vld [vmem:[%s1101_s28 + $0x8] sm:$0xf] }
  0x26   : > { %361 = vrot.lane.b32.xlu1 %v270_v1, %s1042_s6  ;;  %342 = vrot.lane.b32.xlu0 %v334_v8, %s1041_s30 }
  0x2a   : > { %381 = vrot.lane.b32.xlu1 %v296_v2, %s1043_s7  ;;  %363 = vrot.lane.b32.xlu0 %v1021_v9, %s1042_s6 }
  0x2e   : > { %402 = vrot.lane.b32.xlu1 %v270_v1, %s1044_s8  ;;  %383 = vrot.lane.b32.xlu0 %v375_v10, %s1043_s7 }
  0x32   : > { %338 = vrot.lane.b32.xlu1 %v270_v1, %s1041_s30  ;;  %404 = vrot.lane.b32.xlu0 %v1022_v11, %s1044_s8 }
  0x36   : > { %379 = vrot.lane.b32.xlu1 %v270_v1, %s1043_s7  ;;  %359 = vrot.lane.b32.xlu0 %v274_v6, %s1042_s6 }
  0x3a   : > { %420 = vrot.lane.b32.xlu1 %v270_v1, %s1045_s9  ;;  %400 = vrot.lane.b32.xlu0 %v274_v6, %s1044_s8 }
  0x3e   : > { %424 = vrot.lane.b32.xlu1 %v416_v12, %s1045_s9  ;;  %422 = vrot.lane.b32.xlu0 %v296_v2, %s1045_s9 }
  0x42   : > { %583 = vrot.lane.b32.xlu1 %v1023_v13, %s1038_s25  ;;  %581 = vrot.lane.b32.xlu0 %v1137_v14, %s1038_s25 }
  0x46   : > { %602 = vrot.lane.b32.xlu1 %v594_v16, %s1037_s24  ;;  %600 = vrot.lane.b32.xlu0 %v1144_v15, %s1037_s24 }
  0x4a   : > { %622 = vrot.lane.b32.xlu1 %v1026_v17, %s1039_s29  ;;  %620 = vrot.lane.b32.xlu0 %v1137_v14, %s1039_s29 }
  0x4e   : > { %598 = vrot.lane.b32.xlu1 %v1137_v14, %s1037_s24  ;;  %579 = vrot.lane.b32.xlu0 %v577_v18, %s1038_s25 }
  0x52   : > { %639 = vrot.lane.b32.xlu1 %v1144_v15, %s1041_s30  ;;  %618 = vrot.lane.b32.xlu0 %v577_v18, %s1039_s29 }
  0x56   : > { %659 = vrot.lane.b32.xlu1 %v1137_v14, %s1042_s6  ;;  %641 = vrot.lane.b32.xlu0 %v633_v20, %s1041_s30 }
  0x5a   : > { %678 = vrot.lane.b32.xlu1 %v1144_v15, %s1043_s7  ;;  %661 = vrot.lane.b32.xlu0 %v1027_v21, %s1042_s6 }
  0x5e   : > { %698 = vrot.lane.b32.xlu1 %v1137_v14, %s1044_s8  ;;  %680 = vrot.lane.b32.xlu0 %v672_v22, %s1043_s7 }
  0x62   : > { %637 = vrot.lane.b32.xlu1 %v1137_v14, %s1041_s30  ;;  %700 = vrot.lane.b32.xlu0 %v1028_v23, %s1044_s8 }
  0x66   : > { %676 = vrot.lane.b32.xlu1 %v1137_v14, %s1043_s7  ;;  %657 = vrot.lane.b32.xlu0 %v577_v18, %s1042_s6 }
  0x6a   : > { %715 = vrot.lane.b32.xlu1 %v1137_v14, %s1045_s9  ;;  %696 = vrot.lane.b32.xlu0 %v577_v18, %s1044_s8 }
  0x6e   : > { %719 = vrot.lane.b32.xlu1 %v711_v24, %s1045_s9  ;;  %717 = vrot.lane.b32.xlu0 %v1144_v15, %s1045_s9 }
  0x72   : > { %461 = vperm.xlu0 %1016, %v259_v25  }
  0x84   : > { %v302_v26 = vpop.permute.xlu1 %301  ;;  %v279_v27 = vpop.permute.xlu0 %278 }
  0x85   : > { %311 = vst.msk [vmem:[#allocation2 + $0x28] sm:$0xf] %vm268_vm0, %v302_v26 }
  0x88   : > { %v300_v28 = vpop.permute.xlu1 %299  ;;  %v321_v29 = vpop.permute.xlu0 %320 }
  0x89   : > { %v305_v30 = vsel %vm303_vm2, %v300_v28, %v302_v26 }
  0x8a   : > { %310 = vst [vmem:[#allocation2 + $0x20] sm:$0xf] %v305_v30 }
  0x8c   : > { %v323_v31 = vpop.permute.xlu1 %322  ;;  %v281_v32 = vpop.permute.xlu0 %280 }
  0x8d   : > { %v326_v33 = vsel %vm324_vm4, %v321_v29, %v323_v31  ;;  %332 = vst.msk [vmem:[#allocation2 + $0x28] sm:$0xf0] %vm290_vm3, %v323_v31  ;;  %v284_v34 = vsel %vm282_vm5, %v279_v27, %v281_v32  ;;  %291 = vst.msk [vmem:[#allocation2 + $0x10] sm:$0xf0] %vm290_vm3, %v281_v32 }
  0x8e   : > { %331 = vst [vmem:[#allocation2 + $0x20] sm:$0xf0] %v326_v33  ;;  %289 = vst [vmem:[#allocation2 + $0x8] sm:$0xf0] %v284_v34 }
  0x90   : > { %v298_v35 = vpop.permute.xlu1 %297  ;;  %v277_v36 = vpop.permute.xlu0 %276 }
  0x91   : > { %v304_v37 = vsel %vm303_vm2, %v298_v35, %v300_v28  ;;  %v283_v38 = vsel %vm282_vm5, %v277_v36, %v279_v27 }
  0x92   : > { %309 = vst [vmem:[#allocation2 + $0x18] sm:$0xf] %v304_v37  ;;  %288 = vst [vmem:[#allocation2] sm:$0xf0] %v283_v38 }
  0x94   : > { %v341_v40 = vpop.permute.xlu1 %340  ;;  %v319_v41 = vpop.permute.xlu0 %318  ;;  %v437_v42 = vld [vmem:[#allocation2 + $0x10] sm:$0xff]  ;;  %v440_v43 = vld [vmem:[#allocation2 + $0x28] sm:$0xff] }
  0x95   : > { %v325_v44 = vsel %vm324_vm4, %v319_v41, %v321_v29  ;;  %v452_v45 = vpack.c.bf16 %v440_v43, %v437_v42  ;;  %572 = vst.msk [vmem:[#allocation2 + $0x10] sm:$0xf] %vm268_vm0, %v566_v39  ;;  %v436_v46 = vld [vmem:[#allocation2 + $0x8] sm:$0xff]  ;;  %v439_v47 = vld [vmem:[#allocation2 + $0x20] sm:$0xff] }
  0x96   : > { %330 = vst [vmem:[#allocation2 + $0x18] sm:$0xf0] %v325_v44  ;;  %v451_v48 = vpack.c.bf16 %v439_v47, %v436_v46  ;;  %571 = vst [vmem:[#allocation2 + $0x8] sm:$0xf] %v1144_v15  ;;  %v260_v39 = vld [vmem:[%s1285_s2] sm:$0xf] }
  0x97   : > { %976 = vmatpush3.bf16.msra.mxu1 %v452_v45 }
  0x98   : > { %v362_v49 = vpop.permute.xlu1 %361  ;;  %v343_v50 = vpop.permute.xlu0 %342  ;;  %478 = vmatprep.subr.bf16.mxu0 %v451_v48  ;;  %977 = vmatprep.subr.bf16.mxu1 %v1040_v5 }
  0x99   : > { %v346_v51 = vsel %vm344_vm6, %v341_v40, %v343_v50  ;;  %352 = vst.msk [vmem:[#allocation2 + $0x40] sm:$0xf] %vm268_vm0, %v343_v50  ;;  %v435_v52 = vld [vmem:[#allocation2] sm:$0xff] }
  0x9a   : > { %351 = vst [vmem:[#allocation2 + $0x38] sm:$0xf] %v346_v51  ;;  %570 = vst [vmem:[#allocation2] sm:$0xf] %v1137_v14 }
  0x9c   : > { %v382_v53 = vpop.permute.xlu1 %381  ;;  %v364_v54 = vpop.permute.xlu0 %363 }
  0x9d   : > { %v367_v55 = vsel %vm365_vm7, %v362_v49, %v364_v54  ;;  %373 = vst.msk [vmem:[#allocation2 + $0x40] sm:$0xf0] %vm290_vm3, %v364_v54  ;;  %v438_v56 = vld [vmem:[#allocation2 + $0x18] sm:$0xff] }
  0x9e   : > { %372 = vst [vmem:[#allocation2 + $0x38] sm:$0xf0] %v367_v55  ;;  %v450_v57 = vpack.c.bf16 %v438_v56, %v435_v52 }
  0xa0   : > { %v403_v58 = vpop.permute.xlu1 %402  ;;  %v384_v59 = vpop.permute.xlu0 %383  ;;  %479 = vmatpush1.bf16.msra.mxu0 %v450_v57 }
  0xa1   : > { %v387_v60 = vsel %vm385_vm8, %v382_v53, %v384_v59  ;;  %393 = vst.msk [vmem:[#allocation2 + $0x58] sm:$0xf] %vm268_vm0, %v384_v59 }
  0xa2   : > { %392 = vst [vmem:[#allocation2 + $0x50] sm:$0xf] %v387_v60 }
  0xa4   : > { %v339_v61 = vpop.permute.xlu1 %338  ;;  %v405_v62 = vpop.permute.xlu0 %404  ;;  %v443_v8 = vld [vmem:[#allocation2 + $0x40] sm:$0xff] }
  0xa5   : > { %v345_v63 = vsel %vm344_vm6, %v339_v61, %v341_v40  ;;  %v408_v0 = vsel %vm406_vm9, %v403_v58, %v405_v62  ;;  %414 = vst.msk [vmem:[#allocation2 + $0x58] sm:$0xf0] %vm290_vm3, %v405_v62  ;;  %v442_v12 = vld [vmem:[#allocation2 + $0x38] sm:$0xff] }
  0xa6   : > { %350 = vst [vmem:[#allocation2 + $0x30] sm:$0xf] %v345_v63  ;;  %413 = vst [vmem:[#allocation2 + $0x50] sm:$0xf0] %v408_v0 }
  0xa8   : > { %v380_v1 = vpop.permute.xlu1 %379  ;;  %v360_v2 = vpop.permute.xlu0 %359 }
  0xa9   : > { %v386_v3 = vsel %vm385_vm8, %v380_v1, %v382_v53  ;;  %v366_v4 = vsel %vm365_vm7, %v360_v2, %v362_v49 }
  0xaa   : > { %391 = vst [vmem:[#allocation2 + $0x48] sm:$0xf] %v386_v3  ;;  %371 = vst [vmem:[#allocation2 + $0x30] sm:$0xf0] %v366_v4 }
  0xac   : > { %v421_v6 = vpop.permute.xlu1 %420  ;;  %v401_v7 = vpop.permute.xlu0 %400  ;;  %v446_v9 = vld [vmem:[#allocation2 + $0x58] sm:$0xff] }
  0xad   : > { %v407_v10 = vsel %vm406_vm9, %v401_v7, %v403_v58  ;;  %v455_v11 = vpack.c.bf16 %v446_v9, %v443_v8  ;;  %v445_v13 = vld [vmem:[#allocation2 + $0x50] sm:$0xff] }
  0xae   : > { %412 = vst [vmem:[#allocation2 + $0x48] sm:$0xf0] %v407_v10  ;;  %v454_v14 = vpack.c.bf16 %v445_v13, %v442_v12 }
  0xaf   : > { %978 = vmatpush3.bf16.msra.mxu1 %v455_v11 }
  0xb0   : > { %v425_v15 = vpop.permute.xlu1 %424  ;;  %v423_v16 = vpop.permute.xlu0 %422  ;;  %480 = vmatprep.subr.bf16.mxu0 %v454_v14  ;;  %979 = vmatprep.subr.bf16.mxu1 %v1040_v5 }
  0xb1   : > { %434 = vst.msk [vmem:[#allocation2 + $0x70] sm:$0xf] %vm268_vm0, %v425_v15  ;;  %v427_v17 = vsel %vm426_vm10, %v421_v6, %v423_v16  ;;  %v428_v18 = vsel %vm426_vm10, %v423_v16, %v425_v15  ;;  %v441_v23 = vld [vmem:[#allocation2 + $0x30] sm:$0xff] }
  0xb2   : > { %432 = vst [vmem:[#allocation2 + $0x60] sm:$0xf] %v427_v17  ;;  %433 = vst [vmem:[#allocation2 + $0x68] sm:$0xf] %v428_v18 }
  0xb4   : > { %v584_v20 = vpop.permute.xlu1 %583  ;;  %v582_v21 = vpop.permute.xlu0 %581 }
  0xb5   : > { %592 = vst.msk [vmem:[#allocation2 + $0x10] sm:$0xf0] %vm290_vm3, %v584_v20  ;;  %v586_v22 = vsel %vm282_vm5, %v582_v21, %v584_v20  ;;  %v444_v24 = vld [vmem:[#allocation2 + $0x48] sm:$0xff] }
  0xb6   : > { %591 = vst [vmem:[#allocation2 + $0x8] sm:$0xf0] %v586_v22  ;;  %v453_v25 = vpack.c.bf16 %v444_v24, %v441_v23 }
  0xb8   : > { %v603_v26 = vpop.permute.xlu1 %602  ;;  %v601_v27 = vpop.permute.xlu0 %600  ;;  %481 = vmatpush1.bf16.msra.mxu0 %v453_v25  ;;  %v449_v28 = vld [vmem:[#allocation2 + $0x70] sm:$0xf] }
  0xb9   : > { %611 = vst.msk [vmem:[#allocation2 + $0x28] sm:$0xf] %vm268_vm0, %v603_v26  ;;  %v605_v29 = vsel %vm303_vm2, %v601_v27, %v603_v26  ;;  %v448_v30 = vld [vmem:[#allocation2 + $0x68] sm:$0xf]  ;;  %v458_v31 = vpack.c.bf16 %v449_v28, %v449_v28  ;;  %v447_v32 = vld [vmem:[#allocation2 + $0x60] sm:$0xf] }
  0xba   : > { %610 = vst [vmem:[#allocation2 + $0x20] sm:$0xf] %v605_v29  ;;  %v457_v33 = vpack.c.bf16 %v448_v30, %v448_v30  ;;  %v456_v34 = vpack.c.bf16 %v447_v32, %v447_v32 }
  0xbb   : > { %v476_v35 = vsel %vm468_vm11, %v458_v31, 0 }
  0xbc   : > { %v623_v36 = vpop.permute.xlu1 %622  ;;  %v621_v37 = vpop.permute.xlu0 %620  ;;  %958 = vmatprep.subr.msk.bf16.mxu0 %vm468_vm11, %v457_v33  ;;  %980 = vmatpush3.bf16.msra.mxu1 %v476_v35  ;;  %v470_v38 = vsel %vm468_vm11, %v456_v34, 0  ;;  %v731_v47 = vld [vmem:[#allocation2 + $0x10] sm:$0xff]  ;;  %v961_v34 = vld [vmem:[%s1285_s2 + $0x4] sm:$0xf] }
  0xbd   : > { %631 = vst.msk [vmem:[#allocation2 + $0x28] sm:$0xf0] %vm290_vm3, %v623_v36  ;;  %v625_v40 = vsel %vm324_vm4, %v621_v37, %v623_v36  ;;  %483 = vmatpush1.bf16.msra.mxu0 %v470_v38  ;;  %985 = vmatprep.subr.bf16.mxu1 %v1040_v5  ;;  %v730_v51 = vld [vmem:[#allocation2 + $0x8] sm:$0xff] }
  0xbe   : > { %630 = vst [vmem:[#allocation2 + $0x20] sm:$0xf0] %v625_v40 }
  0xbf   : > { %982 = vmatmul.mubr.msk.bf16.vlgmr.msra.gmra.mrb[0].mxu1 %vm464_vm12, %v260_v39 }
  0xc0   : > { %v599_v41 = vpop.permute.xlu1 %598  ;;  %v580_v42 = vpop.permute.xlu0 %579  ;;  %959 = vmatmul.mubr.msk.bf16.vlgmr.msra.gmra.mrb[0].mxu0 %vm464_vm12, %v260_v39  ;;  %991 = vmatprep.mubr.msk.bf16.mxu1 %vm1046_vm1, %v1040_v5 }
  0xc1   : > { %v604_v43 = vsel %vm303_vm2, %v599_v41, %v601_v27  ;;  %v585_v44 = vsel %vm282_vm5, %v580_v42, %v582_v21  ;;  %797 = vmatprep.mubr.bf16.mxu0 %v1047_v19 }
  0xc2   : > { %609 = vst [vmem:[#allocation2 + $0x18] sm:$0xf] %v604_v43  ;;  %590 = vst [vmem:[#allocation2] sm:$0xf0] %v585_v44 }
  0xc4   : > { %v640_v45 = vpop.permute.xlu1 %639  ;;  %v619_v46 = vpop.permute.xlu0 %618  ;;  %v734_v48 = vld [vmem:[#allocation2 + $0x28] sm:$0xff] }
  0xc5   : > { %v624_v49 = vsel %vm324_vm4, %v619_v46, %v621_v37  ;;  %v746_v50 = vpack.c.bf16 %v734_v48, %v731_v47  ;;  %v733_v52 = vld [vmem:[#allocation2 + $0x20] sm:$0xff] }
  0xc6   : > { %629 = vst [vmem:[#allocation2 + $0x18] sm:$0xf0] %v624_v49  ;;  %v745_v53 = vpack.c.bf16 %v733_v52, %v730_v51 }
  0xc7   : > { %986 = vmatpush3.bf16.msra.mxu1 %v746_v50 }
  0xc8   : > { %v660_v54 = vpop.permute.xlu1 %659  ;;  %v642_v55 = vpop.permute.xlu0 %641  ;;  %765 = vmatprep.subr.bf16.mxu0 %v745_v53  ;;  %987 = vmatprep.subr.bf16.mxu1 %v1040_v5 }
  0xc9   : > { %v644_v19 = vsel %vm344_vm6, %v640_v45, %v642_v55  ;;  %650 = vst.msk [vmem:[#allocation2 + $0x40] sm:$0xf] %vm268_vm0, %v642_v55  ;;  %v729_v59 = vld [vmem:[#allocation2] sm:$0xff] }
  0xca   : > { %649 = vst [vmem:[#allocation2 + $0x38] sm:$0xf] %v644_v19 }
  0xcc   : > { %v679_v56 = vpop.permute.xlu1 %678  ;;  %v662_v57 = vpop.permute.xlu0 %661 }
  0xcd   : > { %v664_v58 = vsel %vm365_vm7, %v660_v54, %v662_v57  ;;  %670 = vst.msk [vmem:[#allocation2 + $0x40] sm:$0xf0] %vm290_vm3, %v662_v57  ;;  %v732_v60 = vld [vmem:[#allocation2 + $0x18] sm:$0xff] }
  0xce   : > { %669 = vst [vmem:[#allocation2 + $0x38] sm:$0xf0] %v664_v58  ;;  %v744_v61 = vpack.c.bf16 %v732_v60, %v729_v59 }
  0xd0   : > { %v699_v62 = vpop.permute.xlu1 %698  ;;  %v681_v63 = vpop.permute.xlu0 %680  ;;  %766 = vmatpush1.bf16.msra.mxu0 %v744_v61 }
  0xd1   : > { %v683_v0 = vsel %vm385_vm8, %v679_v56, %v681_v63  ;;  %689 = vst.msk [vmem:[#allocation2 + $0x58] sm:$0xf] %vm268_vm0, %v681_v63 }
  0xd2   : > { %688 = vst [vmem:[#allocation2 + $0x50] sm:$0xf] %v683_v0 }
  0xd4   : > { %v638_v1 = vpop.permute.xlu1 %637  ;;  %v701_v2 = vpop.permute.xlu0 %700  ;;  %v737_v12 = vld [vmem:[#allocation2 + $0x40] sm:$0xff] }
  0xd5   : > { %v643_v3 = vsel %vm344_vm6, %v638_v1, %v640_v45  ;;  %v703_v4 = vsel %vm406_vm9, %v699_v62, %v701_v2  ;;  %709 = vst.msk [vmem:[#allocation2 + $0x58] sm:$0xf0] %vm290_vm3, %v701_v2  ;;  %v736_v16 = vld [vmem:[#allocation2 + $0x38] sm:$0xff] }
  0xd6   : > { %648 = vst [vmem:[#allocation2 + $0x30] sm:$0xf] %v643_v3  ;;  %708 = vst [vmem:[#allocation2 + $0x50] sm:$0xf0] %v703_v4 }
  0xd8   : > { %v677_v6 = vpop.permute.xlu1 %676  ;;  %v658_v7 = vpop.permute.xlu0 %657 }
  0xd9   : > { %v682_v8 = vsel %vm385_vm8, %v677_v6, %v679_v56  ;;  %v663_v9 = vsel %vm365_vm7, %v658_v7, %v660_v54 }
  0xda   : > { %687 = vst [vmem:[#allocation2 + $0x48] sm:$0xf] %v682_v8  ;;  %668 = vst [vmem:[#allocation2 + $0x30] sm:$0xf0] %v663_v9 }
  0xdc   : > { %v716_v10 = vpop.permute.xlu1 %715  ;;  %v697_v11 = vpop.permute.xlu0 %696  ;;  %v740_v13 = vld [vmem:[#allocation2 + $0x58] sm:$0xff] }
  0xdd   : > { %v702_v14 = vsel %vm406_vm9, %v697_v11, %v699_v62  ;;  %v749_v15 = vpack.c.bf16 %v740_v13, %v737_v12  ;;  %v739_v17 = vld [vmem:[#allocation2 + $0x50] sm:$0xff] }
  0xde   : > { %707 = vst [vmem:[#allocation2 + $0x48] sm:$0xf0] %v702_v14  ;;  %v748_v18 = vpack.c.bf16 %v739_v17, %v736_v16 }
  0xdf   : > { %988 = vmatpush3.bf16.msra.mxu1 %v749_v15 }
  0xe0   : > { %v720_v20 = vpop.permute.xlu1 %719  ;;  %v718_v21 = vpop.permute.xlu0 %717  ;;  %767 = vmatprep.subr.bf16.mxu0 %v748_v18  ;;  %989 = vmatprep.subr.bf16.mxu1 %v1040_v5 }
  0xe1   : > { %728 = vst.msk [vmem:[#allocation2 + $0x70] sm:$0xf] %vm268_vm0, %v720_v20  ;;  %v721_v22 = vsel %vm426_vm10, %v716_v10, %v718_v21  ;;  %v722_v23 = vsel %vm426_vm10, %v718_v21, %v720_v20  ;;  %v735_v24 = vld [vmem:[#allocation2 + $0x30] sm:$0xff] }
  0xe2   : > { %726 = vst [vmem:[#allocation2 + $0x60] sm:$0xf] %v721_v22  ;;  %727 = vst [vmem:[#allocation2 + $0x68] sm:$0xf] %v722_v23 }
  0xe5   : > { %v738_v25 = vld [vmem:[#allocation2 + $0x48] sm:$0xff] }
  0xe6   : > { %v747_v26 = vpack.c.bf16 %v738_v25, %v735_v24 }
  0xe8   : > { %768 = vmatpush1.bf16.msra.mxu0 %v747_v26  ;;  %v743_v27 = vld [vmem:[#allocation2 + $0x70] sm:$0xf] }
  0xe9   : > { %v742_v28 = vld [vmem:[#allocation2 + $0x68] sm:$0xf]  ;;  %v752_v29 = vpack.c.bf16 %v743_v27, %v743_v27  ;;  %v741_v30 = vld [vmem:[#allocation2 + $0x60] sm:$0xf] }
  0xea   : > { %v751_v31 = vpack.c.bf16 %v742_v28, %v742_v28  ;;  %v750_v32 = vpack.c.bf16 %v741_v30, %v741_v30 }
  0xeb   : > { %v763_v5 = vsel %vm468_vm11, %v752_v29, 0 }
  0xec   : > { %962 = vmatprep.subr.msk.bf16.mxu0 %vm468_vm11, %v751_v31  ;;  %990 = vmatpush3.bf16.msra.mxu1 %v763_v5  ;;  %v757_v33 = vsel %vm468_vm11, %v750_v32, 0 }
  0xed   : > { %770 = vmatpush1.bf16.msra.mxu0 %v757_v33 }
  0xef   : > { %992 = vmatmul.mubr.msk.bf16.vlgmr.msra.gmra.mrb[4].mxu1 %vm464_vm12, %v961_v34 }
  0xf0   : > { %963 = vmatmul.mubr.msk.bf16.vlgmr.msra.gmra.mrb[4].mxu0 %vm464_vm12, %v961_v34 }
  0xf1   : > { %v462_v35 = vpop.permute.xlu0 %461 }
 0x192   : > { %v553_v36 = vpop.f32.mrb[0].mxu1 }
 0x193   : > { %v512_v37 = vpop.f32.mrb[0].mxu0  ;;  %v983_v38 = vpop.f32.mrb[1].mxu1  ;;  %v554_v39 = vadd.f32 %v553_v36, %v462_v35 }
 0x194   : > { %v514_v40 = vpop.f32.mrb[1].mxu0  ;;  %v513_v41 = vadd.f32 %v512_v37, %v462_v35  ;;  %v556_v42 = vpop.f32.mrb[2].mxu1 }
 0x195   : > { %v516_v43 = vpop.f32.mrb[2].mxu0  ;;  %v515_v44 = vadd.f32 %v514_v40, %v462_v35  ;;  %v984_v45 = vpop.f32.mrb[3].mxu1  ;;  %562 = vst.msk [vmem:[%s252_s21 + $0x10] sm:$0xff] %vm561_vm13, %v554_v39 }
 0x196   : > { %v517_v46 = vpop.f32.mrb[3].mxu0  ;;  %559 = vst [vmem:[%s252_s21] sm:$0xff] %v513_v41 }
 0x197   : > { %560 = vst [vmem:[%s252_s21 + $0x8] sm:$0xff] %v515_v44 }
 0x1c2   : > { %v840_v47 = vpop.f32.mrb[4].mxu1 }
 0x1c3   : > { %v841_v48 = vadd.f32 %v840_v47, %v462_v35  ;;  %v799_v49 = vpop.f32.mrb[4].mxu0  ;;  %v993_v50 = vpop.f32.mrb[5].mxu1 }
 0x1c4   : > { %v800_v51 = vadd.f32 %v799_v49, %v462_v35  ;;  %v801_v52 = vpop.f32.mrb[5].mxu0  ;;  %v843_v53 = vpop.f32.mrb[6].mxu1 }
 0x1c5   : > { %848 = vst.msk [vmem:[%s257_s23 + $0x10] sm:$0xff] %vm561_vm13, %v841_v48  ;;  %v802_v54 = vadd.f32 %v801_v52, %v462_v35  ;;  %v803_v55 = vpop.f32.mrb[6].mxu0  ;;  %v994_v19 = vpop.f32.mrb[7].mxu1 }
 0x1c6   : > { %846 = vst [vmem:[%s257_s23] sm:$0xff] %v800_v51  ;;  %v804_v56 = vpop.f32.mrb[7].mxu0 }
 0x1c7   : > { %847 = vst [vmem:[%s257_s23 + $0x8] sm:$0xff] %v802_v54 }
 0x1c8 PF: > { %s16_s18 = sadd.s32 1, %s1035_s18  }
 0x1c9   : > { %p13_p4 = scmp.ge.s32.totalorder %s16_s18, 4  }
 0x1cb   :  { %15 = sbr.rel (!%p13_p4) target bundleno = 1 (0x1), region = 82 }

</bundles_post_ra>
